<compile_context>
chip_gen: v6e
topology: v6e:2x2x1
jax: 0.10.0
libtpu: 0.0.40
codegen_flags: <defaults>
</compile_context>

<pallas_src>
import functools

import numpy as np
import jax
import jax.numpy as jnp
from jax import lax
from jax.experimental import pallas as pl
from jax.experimental.pallas import tpu as pltpu


MASK_VALUE = -1e30
_ALIGN = 8          # sublane alignment for the KV slab start


def _round_up(x, m):
    return ((x + m - 1) // m) * m


# ----------------------------------------------------------------------------
# NATTEN 1D window helpers.
#   Scalar versions (numpy) are only used by the pure reference; the kernel
#   path uses the vectorized jnp table builder below (device-side, O(L)).
# ----------------------------------------------------------------------------
def _window_start(i, L, K, d):
    ns = K // 2
    if d <= 1:
        s = max(i - ns, 0)
        if i + ns >= L:
            s += L - i - ns - 1
        return s
    ni = i - ns * d
    if ni < 0:
        return i % d
    if i + ns * d >= L:
        imodd = i % d
        a = (L // d) * d
        b = L - a
        if imodd < b:
            return L - b + imodd - 2 * ns * d
        return a + imodd - K * d
    return ni


def _pb_start(i, L, K, d):
    ns = K // 2
    if d <= 1:
        s = ns
        if i < ns:
            s += ns - i
        if i + ns >= L:
            s += L - i - 1 - ns
        return s
    if i - ns * d < 0:
        return K - 1 - (i // d)
    if i + ns * d >= L:
        return (L - i - 1) // d
    return ns


def _build_window_tables(rpb, L_sem, L_tile, K, d):
    """Vectorized, device-side construction of the per-row tables.

    Returns:
      ws_tab:   (L_tile, 1) int32  -- neighborhood window start per query row.
      rpb_rows: (H, L_tile, K) f32 -- rpb value per query row and window slot.
    """
    ns = K // 2
    i = jnp.arange(L_sem, dtype=jnp.int32)
    if d <= 1:
        ws = jnp.maximum(i - ns, 0)
        ws = jnp.where(i + ns >= L_sem, ws + (L_sem - i - ns - 1), ws)
        ps = jnp.full_like(i, ns)
        ps = jnp.where(i < ns, ps + (ns - i), ps)
        ps = jnp.where(i + ns >= L_sem, ps + (L_sem - i - 1 - ns), ps)
    else:
        imodd = i % d
        a = (L_sem // d) * d
        rem = L_sem - a
        ws_right = jnp.where(imodd < rem,
                             L_sem - rem + imodd - 2 * ns * d,
                             a + imodd - K * d)
        ws = jnp.where(i - ns * d < 0, imodd,
                       jnp.where(i + ns * d >= L_sem, ws_right, i - ns * d))
        ps = jnp.where(i - ns * d < 0, K - 1 - (i // d),
                       jnp.where(i + ns * d >= L_sem, (L_sem - i - 1) // d, ns))
    idx = ps[:, None] + jnp.arange(K, dtype=jnp.int32)[None, :]      # (L_sem, K)
    rpb_rows = jnp.take(rpb, idx, axis=1).astype(jnp.float32)        # (H, L_sem, K)
    if L_tile > L_sem:
        pad = L_tile - L_sem
        ws = jnp.pad(ws, (0, pad))
        rpb_rows = jnp.pad(rpb_rows, ((0, 0), (0, pad), (0, 0)))
    return ws.reshape(L_tile, 1), rpb_rows


# ----------------------------------------------------------------------------
# Neighborhood attention kernel: one widened KV slab per query tile,
# plain softmax, fused output projection.
# ----------------------------------------------------------------------------
def _nat_attn_kernel(ws_ref, rpb_ref, q_ref, wp_ref, bp_ref, k_hbm, v_hbm,
                     o_ref, k_slab, v_slab, sem, *,
                     H, Dh, K, d, T, W, L, P):
    b = pl.program_id(0)
    qi = pl.program_id(1)

    # KV slab row offset: clamp into [0, L-W], then align down to sublanes.
    # W includes enough slack that clamping/alignment never drops a window key.
    start = jnp.minimum(jnp.maximum(qi * T - P, 0), L - W)
    start = pl.multiple_of((start // _ALIGN) * _ALIGN, _ALIGN)

    cp_k = pltpu.make_async_copy(k_hbm.at[b, pl.ds(start, W), :], k_slab, sem.at[0])
    cp_v = pltpu.make_async_copy(v_hbm.at[b, pl.ds(start, W), :], v_slab, sem.at[1])
    cp_k.start()
    cp_v.start()
    # TODO(synk): slab fetch is per-step synchronous; a cross-step double
    # buffer (arbitrary grid semantics) would hide this latency on v7x.

    # Head-independent work, overlapped with the slab DMAs.
    ws_col = ws_ref[...]                                     # (T, 1) i32
    rpb_all = rpb_ref[...]                                   # (H, T, K) f32
    q_all = q_ref[...]                                       # (T, C) bf16 (scale folded in)
    cols = start + lax.broadcasted_iota(jnp.int32, (T, W), 1)
    rel = cols - ws_col                                      # (T, W) i32
    neg = jnp.full((T, W), MASK_VALUE, dtype=jnp.float32)

    cp_k.wait()
    k_all = k_slab[...]                                      # (W, C) bf16
    cp_v.wait()
    v_all = v_slab[...]                                      # (W, C) bf16

    # TODO(synk): if H is large and Dh >= 128, move the head loop into the
    # grid instead of this static unroll.
    outs = []
    for h in range(H):
        qh = q_all[:, h * Dh:(h + 1) * Dh]
        kh = k_all[:, h * Dh:(h + 1) * Dh]
        vh = v_all[:, h * Dh:(h + 1) * Dh]

        # QK^T on the MXU, bf16 operands, f32 accumulation.
        s = lax.dot_general(qh, kh, (((1,), (1,)), ((), ())),
                            preferred_element_type=jnp.float32)        # (T, W)

        # Combined additive mask + relative-position bias via rolling select;
        # compares recomputed per slot -> no K live (T, W) masks.
        bias = neg
        for kj in range(K):
            bias = jnp.where(rel == kj * d, rpb_all[h, :, kj:kj + 1], bias)
        sb = s + bias

        # Plain softmax over the slab (out-of-window cols are ~-1e30 -> exp=0).
        m = jnp.max(sb, axis=-1, keepdims=True)
        p = jnp.exp(sb - m)
        l = jnp.sum(p, axis=-1, keepdims=True)
        pv = lax.dot_general(p.astype(v_all.dtype), vh, (((1,), (0,)), ((), ())),
                             preferred_element_type=jnp.float32)       # (T, Dh)
        outs.append(pv * pl.reciprocal(l, approx=False))

    attn = jnp.concatenate(outs, axis=-1).astype(jnp.bfloat16)         # (T, C)
    # Fused output projection (weight resident in VMEM), single (T, C) store.
    proj = jnp.dot(attn, wp_ref[...], preferred_element_type=jnp.float32)
    o_ref[...] = (proj + bp_ref[...]).astype(o_ref.dtype)


def neighborhood_attention(q, k, v, ws_tab, rpb_rows, w_proj, b_proj, *,
                           kernel_size, dilation, block, out_dtype):
    """q, k, v: (B, L, C) bf16; ws_tab: (L, 1) i32; rpb_rows: (H, L, K) f32."""
    B, L, C = q.shape
    H, _, K = rpb_rows.shape
    Dh = C // H
    T = block
    assert L % T == 0
    nq = L // T
    # One-sided key reach incl. boundary-shifted windows, plus alignment slack.
    P = (kernel_size - 1) * dilation
    W = min(L, _round_up(T + 2 * P + _ALIGN, _ALIGN))

    kernel = functools.partial(_nat_attn_kernel, H=H, Dh=Dh, K=kernel_size,
                               d=dilation, T=T, W=W, L=L, P=P)

    return pl.pallas_call(
        kernel,
        out_shape=jax.ShapeDtypeStruct((B, L, C), out_dtype),
        grid=(B, nq),
        in_specs=[
            pl.BlockSpec((T, 1), lambda b, qi: (qi, 0)),
            pl.BlockSpec((H, T, K), lambda b, qi: (0, qi, 0)),
            pl.BlockSpec((None, T, C), lambda b, qi: (b, qi, 0)),
            pl.BlockSpec((C, C), lambda b, qi: (0, 0)),      # resident proj weight
            pl.BlockSpec((1, C), lambda b, qi: (0, 0)),      # resident proj bias
            pl.BlockSpec(memory_space=pl.ANY),               # k (HBM, manual DMA)
            pl.BlockSpec(memory_space=pl.ANY),               # v (HBM, manual DMA)
        ],
        out_specs=pl.BlockSpec((None, T, C), lambda b, qi: (b, qi, 0)),
        scratch_shapes=[
            pltpu.VMEM((W, C), k.dtype),                     # k slab
            pltpu.VMEM((W, C), v.dtype),                     # v slab
            pltpu.SemaphoreType.DMA((2,)),
        ],
        compiler_params=pltpu.CompilerParams(
            dimension_semantics=("parallel", "parallel")),
    )(ws_tab, rpb_rows, q, w_proj, b_proj, k, v)


# ----------------------------------------------------------------------------
# Row-tiled fused qkv projection (weights resident in VMEM, bf16 MXU / f32 acc)
# ----------------------------------------------------------------------------
def _qkv_kernel(x_ref, wq_ref, wk_ref, wv_ref, bq_ref, bk_ref, bv_ref,
                q_ref, k_ref, v_ref):
    x = x_ref[...]
    if x.dtype != jnp.bfloat16:
        x = x.astype(jnp.bfloat16)
    for w_ref, b_ref, o_ref in ((wq_ref, bq_ref, q_ref),
                                (wk_ref, bk_ref, k_ref),
                                (wv_ref, bv_ref, v_ref)):
        acc = jnp.dot(x, w_ref[...], preferred_element_type=jnp.float32)
        o_ref[...] = (acc + b_ref[...]).astype(o_ref.dtype)


def qkv_projection(x2d, wq, wk, wv, bq, bk, bv, *, out_dtype=jnp.bfloat16,
                   block_rows=256):
    """x2d: (M, C) -> (q, k, v) each (M, C)."""
    M, Cin = x2d.shape
    Cout = wq.shape[1]
    tm = min(block_rows, M)
    # TODO(synk): for dim >~1.3k on v7x (64 MiB VMEM) the 3 resident weights
    # need an explicit vmem_limit_bytes / Cout grid axis; fine at these sizes.
    w_spec = pl.BlockSpec((Cin, Cout), lambda i: (0, 0))
    b_spec = pl.BlockSpec((1, Cout), lambda i: (0, 0))
    o_spec = pl.BlockSpec((tm, Cout), lambda i: (i, 0))
    return pl.pallas_call(
        _qkv_kernel,
        out_shape=tuple(jax.ShapeDtypeStruct((M, Cout), out_dtype)
                        for _ in range(3)),
        grid=(pl.cdiv(M, tm),),
        in_specs=[pl.BlockSpec((tm, Cin), lambda i: (i, 0)),
                  w_spec, w_spec, w_spec, b_spec, b_spec, b_spec],
        out_specs=(o_spec, o_spec, o_spec),
        compiler_params=pltpu.CompilerParams(
            dimension_semantics=("parallel",)),
    )(x2d, wq, wk, wv, bq.reshape(1, Cout), bk.reshape(1, Cout),
      bv.reshape(1, Cout))


# ----------------------------------------------------------------------------
# Module (parameters + forward wrapper)
# ----------------------------------------------------------------------------
class NeighborhoodAttention1D:
    def __init__(self, dim, num_heads, kernel_size, dilation=1, key=None):
        assert kernel_size > 1 and kernel_size % 2 == 1
        assert dilation >= 1
        assert dim % num_heads == 0
        self.dim = dim
        self.num_heads = num_heads
        self.head_dim = dim // num_heads
        self.scale = self.head_dim ** (-0.5)
        self.kernel_size = kernel_size
        self.dilation = dilation
        self.window_size = kernel_size * dilation

        key = jax.random.PRNGKey(0) if key is None else key
        k1, k2, k3, k4, k5 = jax.random.split(key, 5)
        # f32 master parameters (also used by the pure reference)
        self.w_qkv = (0.02 * jax.random.normal(k1, (dim, 3 * dim))).astype(jnp.float32)
        self.b_qkv = (0.02 * jax.random.normal(k2, (3 * dim,))).astype(jnp.float32)
        # TODO(synk): torch trunc_normal_ init approximated with a plain normal.
        self.rpb = (0.02 * jax.random.normal(k3, (num_heads, 2 * kernel_size - 1))
                    ).astype(jnp.float32)
        self.w_proj = (0.02 * jax.random.normal(k4, (dim, dim))).astype(jnp.float32)
        self.b_proj = (0.02 * jax.random.normal(k5, (dim,))).astype(jnp.float32)

        # bf16 MXU operand copies (f32 accumulation happens inside the kernels).
        # The 1/sqrt(head_dim) softmax scale is folded into wq / bq here.
        C = dim
        self.wq_bf = (self.w_qkv[:, :C] * self.scale).astype(jnp.bfloat16)
        self.wk_bf = self.w_qkv[:, C:2 * C].astype(jnp.bfloat16)
        self.wv_bf = self.w_qkv[:, 2 * C:].astype(jnp.bfloat16)
        self.bq = self.b_qkv[:C] * self.scale
        self.bk = self.b_qkv[C:2 * C]
        self.bv = self.b_qkv[2 * C:]
        self.w_proj_bf = self.w_proj.astype(jnp.bfloat16)
        self.b_proj2d = self.b_proj.reshape(1, C)

    def __call__(self, x):
        B, Lp, C = x.shape
        assert C == self.dim
        # Module semantics: pad sequence up to window_size if shorter.
        L_sem = max(Lp, self.window_size)
        # Extra zero padding so L divides evenly into query tiles; the padded
        # query rows produce garbage that is sliced off (tables use L_sem).
        T = min(128, _round_up(L_sem, 8))
        L = _round_up(L_sem, T)
        if L != Lp:
            x = jnp.pad(x, ((0, 0), (0, L - Lp), (0, 0)))

        M = B * L
        # fused qkv projection (single pass over x, resident bf16 weights)
        q, k, v = qkv_projection(x.reshape(M, C), self.wq_bf, self.wk_bf,
                                 self.wv_bf, self.bq, self.bk, self.bv)
        q = q.reshape(B, L, C)
        k = k.reshape(B, L, C)
        v = v.reshape(B, L, C)

        # small per-row window/rpb tables (device-side, vectorized)
        ws_tab, rpb_rows = _build_window_tables(
            self.rpb, L_sem, L, self.kernel_size, self.dilation)

        # single-slab neighborhood attention + fused output projection
        out = neighborhood_attention(
            q, k, v, ws_tab, rpb_rows, self.w_proj_bf, self.b_proj2d,
            kernel_size=self.kernel_size, dilation=self.dilation, block=T,
            out_dtype=x.dtype)
        return out[:, :Lp, :]


# ----------------------------------------------------------------------------
# Pure numpy reference (explicit per-query window gather) for verification
# ----------------------------------------------------------------------------
def reference_forward(mod, x):
    x = np.asarray(x, dtype=np.float32)
    B, Lp, C = x.shape
    L = Lp
    if L < mod.window_size:
        x = np.pad(x, ((0, 0), (0, mod.window_size - L), (0, 0)))
        L = x.shape[1]
    qkv = x.reshape(B * L, C) @ np.asarray(mod.w_qkv) + np.asarray(mod.b_qkv)
    qkv = qkv.reshape(B, L, 3, mod.num_heads, mod.head_dim).transpose(2, 0, 3, 1, 4)
    q, k, v = qkv[0] * mod.scale, qkv[1], qkv[2]
    rpb = np.asarray(mod.rpb)
    K, d = mod.kernel_size, mod.dilation
    out = np.zeros_like(q)
    for b in range(B):
        for h in range(mod.num_heads):
            for i in range(L):
                ws = _window_start(i, L, K, d)
                ps = _pb_start(i, L, K, d)
                idx = [ws + kj * d for kj in range(K)]
                scores = k[b, h, idx] @ q[b, h, i] + rpb[h, ps:ps + K]
                scores = scores - scores.max()
                p = np.exp(scores)
                p = p / p.sum()
                out[b, h, i] = p @ v[b, h, idx]
    out = out.transpose(0, 2, 1, 3).reshape(B, L, C)[:, :Lp, :]
    out = out.reshape(B * Lp, C) @ np.asarray(mod.w_proj) + np.asarray(mod.b_proj)
    return out.reshape(B, Lp, C)


# ----------------------------------------------------------------------------
if __name__ == "__main__":
    configs = [
        # (B, Lp, dim, num_heads, kernel_size, dilation)
        (2, 16, 32, 4, 5, 1),    # single tile, slab == full sequence
        (1, 10, 32, 4, 7, 2),    # Lp < window_size -> module padding path
        (1, 500, 32, 4, 3, 2),   # multi-tile, widened-slab path + ragged L
    ]
    key = jax.random.PRNGKey(0)
    for (B, Lp, dim, num_heads, kernel_size, dilation) in configs:
        key, kx, kp = jax.random.split(key, 3)
        x = jax.random.normal(kx, (B, Lp, dim), dtype=jnp.float32)
        mod = NeighborhoodAttention1D(dim, num_heads, kernel_size, dilation,
                                      key=kp)
        y = jax.block_until_ready(mod(x))
        y_ref = reference_forward(mod, x)
        # bf16 MXU operands with f32 accumulation -> slightly looser tolerance
        np.testing.assert_allclose(np.asarray(y), y_ref, rtol=3e-2, atol=3e-3)
    print("KERNEL_OK")
</pallas_src>

<mosaic_0001>
module attributes {stable_mosaic.version = 11 : i64} {
  func.func @_qkv_kernel(%arg0: i32, %arg1: memref<32x32xf32, #tpu.memory_space<vmem>>, %arg2: memref<32x32xbf16, #tpu.memory_space<vmem>>, %arg3: memref<32x32xbf16, #tpu.memory_space<vmem>>, %arg4: memref<32x32xbf16, #tpu.memory_space<vmem>>, %arg5: memref<1x32xf32, #tpu.memory_space<vmem>>, %arg6: memref<1x32xf32, #tpu.memory_space<vmem>>, %arg7: memref<1x32xf32, #tpu.memory_space<vmem>>, %arg8: memref<32x32xbf16, #tpu.memory_space<vmem>>, %arg9: memref<32x32xbf16, #tpu.memory_space<vmem>>, %arg10: memref<32x32xbf16, #tpu.memory_space<vmem>>) attributes {dimension_semantics = [#tpu.dimension_semantics<parallel>], iteration_bounds = array<i64: 1>, scalar_prefetch = 0 : i64, scratch_operands = 0 : i64, tpu.core_type = #tpu.core_type<tc>, window_params = [{transform_indices = @transform_0, window_bounds = array<i64: 32, 32>}, {pipeline_mode = #tpu.pipeline_mode<synchronous>, transform_indices = @transform_1, window_bounds = array<i64: 32, 32>}, {pipeline_mode = #tpu.pipeline_mode<synchronous>, transform_indices = @transform_2, window_bounds = array<i64: 32, 32>}, {pipeline_mode = #tpu.pipeline_mode<synchronous>, transform_indices = @transform_3, window_bounds = array<i64: 32, 32>}, {pipeline_mode = #tpu.pipeline_mode<synchronous>, transform_indices = @transform_4, window_bounds = array<i64: 1, 32>}, {pipeline_mode = #tpu.pipeline_mode<synchronous>, transform_indices = @transform_5, window_bounds = array<i64: 1, 32>}, {pipeline_mode = #tpu.pipeline_mode<synchronous>, transform_indices = @transform_6, window_bounds = array<i64: 1, 32>}, {transform_indices = @transform_7, window_bounds = array<i64: 32, 32>}, {transform_indices = @transform_8, window_bounds = array<i64: 32, 32>}, {transform_indices = @transform_9, window_bounds = array<i64: 32, 32>}]} {
    %c0 = arith.constant 0 : index
    %c0_0 = arith.constant 0 : index
    %0 = vector.load %arg1[%c0, %c0_0] : memref<32x32xf32, #tpu.memory_space<vmem>>, vector<32x32xf32>
    %1 = arith.truncf %0 : vector<32x32xf32> to vector<32x32xbf16>
    %c0_1 = arith.constant 0 : index
    %c0_2 = arith.constant 0 : index
    %2 = vector.load %arg2[%c0_1, %c0_2] : memref<32x32xbf16, #tpu.memory_space<vmem>>, vector<32x32xbf16>
    %cst = arith.constant dense<0.000000e+00> : vector<32x32xf32>
    %3 = tpu.matmul %1, %2, %cst {dimension_numbers = #tpu.dot_dimension_numbers<[1], [0], [0], [1], [0, 0, 1, 1], [], []>} : vector<32x32xbf16>, vector<32x32xbf16>, vector<32x32xf32> -> vector<32x32xf32>
    %c0_3 = arith.constant 0 : index
    %c0_4 = arith.constant 0 : index
    %4 = vector.load %arg5[%c0_3, %c0_4] : memref<1x32xf32, #tpu.memory_space<vmem>>, vector<1x32xf32>
    %5 = vector.broadcast %4 : vector<1x32xf32> to vector<32x32xf32>
    %6 = arith.addf %3, %5 : vector<32x32xf32>
    %7 = arith.truncf %6 : vector<32x32xf32> to vector<32x32xbf16>
    %c0_5 = arith.constant 0 : index
    %c0_6 = arith.constant 0 : index
    %8 = vector.load %arg8[%c0_5, %c0_6] : memref<32x32xbf16, #tpu.memory_space<vmem>>, vector<32x32xbf16>
    tpu.vector_store %arg8[%c0_5, %c0_6], %7 {strides = array<i32>} : memref<32x32xbf16, #tpu.memory_space<vmem>>, vector<32x32xbf16>,
    %c0_7 = arith.constant 0 : index
    %c0_8 = arith.constant 0 : index
    %9 = vector.load %arg3[%c0_7, %c0_8] : memref<32x32xbf16, #tpu.memory_space<vmem>>, vector<32x32xbf16>
    %cst_9 = arith.constant dense<0.000000e+00> : vector<32x32xf32>
    %10 = tpu.matmul %1, %9, %cst_9 {dimension_numbers = #tpu.dot_dimension_numbers<[1], [0], [0], [1], [0, 0, 1, 1], [], []>} : vector<32x32xbf16>, vector<32x32xbf16>, vector<32x32xf32> -> vector<32x32xf32>
    %c0_10 = arith.constant 0 : index
    %c0_11 = arith.constant 0 : index
    %11 = vector.load %arg6[%c0_10, %c0_11] : memref<1x32xf32, #tpu.memory_space<vmem>>, vector<1x32xf32>
    %12 = vector.broadcast %11 : vector<1x32xf32> to vector<32x32xf32>
    %13 = arith.addf %10, %12 : vector<32x32xf32>
    %14 = arith.truncf %13 : vector<32x32xf32> to vector<32x32xbf16>
    %c0_12 = arith.constant 0 : index
    %c0_13 = arith.constant 0 : index
    %15 = vector.load %arg9[%c0_12, %c0_13] : memref<32x32xbf16, #tpu.memory_space<vmem>>, vector<32x32xbf16>
    tpu.vector_store %arg9[%c0_12, %c0_13], %14 {strides = array<i32>} : memref<32x32xbf16, #tpu.memory_space<vmem>>, vector<32x32xbf16>,
    %c0_14 = arith.constant 0 : index
    %c0_15 = arith.constant 0 : index
    %16 = vector.load %arg4[%c0_14, %c0_15] : memref<32x32xbf16, #tpu.memory_space<vmem>>, vector<32x32xbf16>
    %cst_16 = arith.constant dense<0.000000e+00> : vector<32x32xf32>
    %17 = tpu.matmul %1, %16, %cst_16 {dimension_numbers = #tpu.dot_dimension_numbers<[1], [0], [0], [1], [0, 0, 1, 1], [], []>} : vector<32x32xbf16>, vector<32x32xbf16>, vector<32x32xf32> -> vector<32x32xf32>
    %c0_17 = arith.constant 0 : index
    %c0_18 = arith.constant 0 : index
    %18 = vector.load %arg7[%c0_17, %c0_18] : memref<1x32xf32, #tpu.memory_space<vmem>>, vector<1x32xf32>
    %19 = vector.broadcast %18 : vector<1x32xf32> to vector<32x32xf32>
    %20 = arith.addf %17, %19 : vector<32x32xf32>
    %21 = arith.truncf %20 : vector<32x32xf32> to vector<32x32xbf16>
    %c0_19 = arith.constant 0 : index
    %c0_20 = arith.constant 0 : index
    %22 = vector.load %arg10[%c0_19, %c0_20] : memref<32x32xbf16, #tpu.memory_space<vmem>>, vector<32x32xbf16>
    tpu.vector_store %arg10[%c0_19, %c0_20], %21 {strides = array<i32>} : memref<32x32xbf16, #tpu.memory_space<vmem>>, vector<32x32xbf16>,
    return
  }
  func.func @transform_0(%arg0: i32) -> (i32, i32) {
    %c0_i32 = arith.constant 0 : i32
    %c0_i32_0 = arith.constant 0 : i32
    return %arg0, %c0_i32 : i32, i32
  }
  func.func @transform_1(%arg0: i32) -> (i32, i32) {
    %c0_i32 = arith.constant 0 : i32
    %c0_i32_0 = arith.constant 0 : i32
    %c0_i32_1 = arith.constant 0 : i32
    return %c0_i32, %c0_i32_0 : i32, i32
  }
  func.func @transform_2(%arg0: i32) -> (i32, i32) {
    %c0_i32 = arith.constant 0 : i32
    %c0_i32_0 = arith.constant 0 : i32
    %c0_i32_1 = arith.constant 0 : i32
    return %c0_i32, %c0_i32_0 : i32, i32
  }
  func.func @transform_3(%arg0: i32) -> (i32, i32) {
    %c0_i32 = arith.constant 0 : i32
    %c0_i32_0 = arith.constant 0 : i32
    %c0_i32_1 = arith.constant 0 : i32
    return %c0_i32, %c0_i32_0 : i32, i32
  }
  func.func @transform_4(%arg0: i32) -> (i32, i32) {
    %c0_i32 = arith.constant 0 : i32
    %c0_i32_0 = arith.constant 0 : i32
    %c0_i32_1 = arith.constant 0 : i32
    return %c0_i32, %c0_i32_0 : i32, i32
  }
  func.func @transform_5(%arg0: i32) -> (i32, i32) {
    %c0_i32 = arith.constant 0 : i32
    %c0_i32_0 = arith.constant 0 : i32
    %c0_i32_1 = arith.constant 0 : i32
    return %c0_i32, %c0_i32_0 : i32, i32
  }
  func.func @transform_6(%arg0: i32) -> (i32, i32) {
    %c0_i32 = arith.constant 0 : i32
    %c0_i32_0 = arith.constant 0 : i32
    %c0_i32_1 = arith.constant 0 : i32
    return %c0_i32, %c0_i32_0 : i32, i32
  }
  func.func @transform_7(%arg0: i32) -> (i32, i32) {
    %c0_i32 = arith.constant 0 : i32
    %c0_i32_0 = arith.constant 0 : i32
    return %arg0, %c0_i32 : i32, i32
  }
  func.func @transform_8(%arg0: i32) -> (i32, i32) {
    %c0_i32 = arith.constant 0 : i32
    %c0_i32_0 = arith.constant 0 : i32
    return %arg0, %c0_i32 : i32, i32
  }
  func.func @transform_9(%arg0: i32) -> (i32, i32) {
    %c0_i32 = arith.constant 0 : i32
    %c0_i32_0 = arith.constant 0 : i32
    return %arg0, %c0_i32 : i32, i32
  }
}

</mosaic_0001>

<bundles_post_ra>
// kernel: tpu_custom_call.1
= control target key start
LH: loop header
LB: loop body
LE: loop exit
PB: predicated region body
PF: predicated region fallthrough
CT: control target
= control target key end

     0   :  { %15 = vsyncpa [#allocation3], 0  ;;  %s796_s0 = inlined_call_operand.hbm [shape: f32[32,32], index: 0, kind: input, shape index: {}]   ;;  %s797_s1 = inlined_call_operand.hbm [shape: bf16[32,32], index: 1, kind: input, shape index: {}]   ;;  %s798_s2 = inlined_call_operand.hbm [shape: bf16[32,32], index: 2, kind: input, shape index: {}]   ;;  %s799_s3 = inlined_call_operand.hbm [shape: bf16[32,32], index: 3, kind: input, shape index: {}]   ;;  %s800_s4 = inlined_call_operand.vmem [shape: f32[1,32], index: 4, kind: input, shape index: {}]   ;;  %s801_s5 = inlined_call_operand.vmem [shape: f32[1,32], index: 5, kind: input, shape index: {}]   ;;  %s802_s6 = inlined_call_operand.vmem [shape: f32[1,32], index: 6, kind: input, shape index: {}]   ;;  %s803_s7 = inlined_call_operand.hbm [shape: bf16[32,32], index: 7, kind: output, shape index: {0}]   ;;  %s804_s8 = inlined_call_operand.hbm [shape: bf16[32,32], index: 8, kind: output, shape index: {1}]   ;;  %s805_s9 = inlined_call_operand.hbm [shape: bf16[32,32], index: 9, kind: output, shape index: {2}]  }
   0x1   :  { %16 = vsyncpa [#allocation6], 0 }
   0x2   :  { %17 = vsyncpa [#allocation9], 0 }
   0x3   :  { %18 = vsyncpa [#allocation4], 0 }
   0x4   :  { %19 = vsyncpa [#allocation12], 0  ;;  %s669_s30 = smov [#allocation5]  }
   0x5   :  { %s37_s10 = sshll.u32 %s669_s30, 4  ;;  %s38_s10 = int_to_ptr.vmem [resolvable:$true] %s37_s10 }
   0x6   :  { %s527_s11 = scalar_lea.vmem %s38_s10, 256  ;;  %p532_p1 = scmp.lt.s32.totalorder %s38_s10, %s38_s10 }
   0x7   :  { %p528_p0 = scmp.ne.s32.totalorder %s38_s10, %s527_s11  ;;  %p533_p2 = scmp.lt.s32.totalorder %s527_s11, %s527_s11 }
   0x9   :  { %p534_p3 = por %p533_p2, %p532_p1 }
   0xb   :  { %p535_p4 = pnand %p534_p3, %p528_p0 }
   0xd   :  { %538 = shalt.err (!%p535_p4)
}
   0xe   :  { %s670_s12 = smov 64   ;;  %s671_s13 = smov 4  }
   0xf   :  { %43 = dma.hbm_to_vmem [thread:$0]  %s797_s1, 256, %s38_s10, [#allocation6], %s670_s12, %s670_s12, %s671_s13  }
  0x10   :  { %s672_s16 = smov [#allocation2]  }
  0x11   :  { %s25_s17 = sshll.u32 %s672_s16, 4  ;;  %s26_s17 = int_to_ptr.vmem [resolvable:$true] %s25_s17 }
  0x12   :  { %s547_s18 = scalar_lea.vmem %s26_s17, 512  ;;  %p552_p6 = scmp.lt.s32.totalorder %s26_s17, %s26_s17 }
  0x13   :  { %p548_p5 = scmp.ne.s32.totalorder %s26_s17, %s547_s18  ;;  %p553_p7 = scmp.lt.s32.totalorder %s547_s18, %s547_s18 }
  0x15   :  { %p554_p8 = por %p553_p7, %p552_p6 }
  0x17   :  { %p555_p9 = pnand %p554_p8, %p548_p5 }
  0x19   :  { %558 = shalt.err (!%p555_p9)
}
  0x1a   :  { %s673_s19 = smov 128   ;;  %s674_s20 = smov 8  }
  0x1b   :  { %31 = dma.hbm_to_vmem [thread:$0]  %s796_s0, 512, %s26_s17, [#allocation3], %s673_s19, %s673_s19, %s674_s20  }
  0x1c   :  { %s675_s23 = smov [#allocation7]   ;;  %s676_s25 = smov [#allocation8]  }
  0x1d   :  { %s49_s24 = sshll.u32 %s675_s23, 4  ;;  %s61_s1 = sshll.u32 %s676_s25, 4  ;;  %s50_s24 = int_to_ptr.vmem [resolvable:$true] %s49_s24  ;;  %s62_s1 = int_to_ptr.vmem [resolvable:$true] %s61_s1 }
  0x1e   :  { %s567_s26 = scalar_lea.vmem %s50_s24, 256  ;;  %p572_p11 = scmp.lt.s32.totalorder %s50_s24, %s50_s24 }
  0x1f   :  { %p568_p10 = scmp.ne.s32.totalorder %s50_s24, %s567_s26  ;;  %p573_p12 = scmp.lt.s32.totalorder %s567_s26, %s567_s26 }
  0x21   :  { %p574_p13 = por %p573_p12, %p572_p11 }
  0x23   :  { %p575_p0 = pnand %p574_p13, %p568_p10 }
  0x25   :  { %578 = shalt.err (!%p575_p0)
}
  0x26   :  { %55 = dma.hbm_to_vmem [thread:$0]  %s798_s2, 256, %s50_s24, [#allocation6], %s670_s12, %s670_s12, %s671_s13  }
  0x27   :  { %s587_s0 = scalar_lea.vmem %s62_s1, 256  ;;  %p592_p2 = scmp.lt.s32.totalorder %s62_s1, %s62_s1 }
  0x28   :  { %p588_p1 = scmp.ne.s32.totalorder %s62_s1, %s587_s0  ;;  %p593_p3 = scmp.lt.s32.totalorder %s587_s0, %s587_s0 }
  0x2a   :  { %p594_p4 = por %p593_p3, %p592_p2 }
  0x2c   :  { %p595_p5 = pnand %p594_p4, %p588_p1 }
  0x2e   :  { %598 = shalt.err (!%p595_p5)
}
  0x2f   :  { %67 = dma.hbm_to_vmem [thread:$0]  %s799_s3, 256, %s62_s1, [#allocation9], %s670_s12, %s670_s12, %s671_s13  }
  0x30   :  { %659 = dma.done.wait [#allocation3], 512  }
  0x31   :  { %660 = vsyncadd [#allocation3], 4294966784 }
  0x32   :  { %661 = dma.done.wait [#allocation6], 512  }
  0x33   :  { %662 = vsyncadd [#allocation6], 4294966784 }
  0x34   :  { %663 = dma.done.wait [#allocation9], 256  }
  0x35   :  { %664 = vsyncadd [#allocation9], 4294967040  ;;  %v513_v0 = vld [vmem:[#allocation5 + $0x8] sm:$0xff]   ;;  %v514_v1 = vld [vmem:[#allocation7 + $0x8] sm:$0xff]   ;;  %vm116_vm0 = vcmask 261120   ;;  %vm188_vm1 = vcmask 257024  }
  0x36   :  { %478 = vmatprep.subr.bf16.mxu0 %v513_v0  ;;  %v515_v2 = vld [vmem:[#allocation5] sm:$0xff]   ;;  %486 = vmatprep.subr.bf16.mxu1 %v514_v1  ;;  %v516_v3 = vld [vmem:[#allocation7] sm:$0xff]   ;;  %v88_v5 = vld [vmem:[#allocation2 + $0x8] sm:$0xff]  ;;  %s677_s14 = smov [#allocation10]   ;;  %s678_s16 = smov [#allocation11]  }
  0x37   :  { %479 = vmatpush3.bf16.msra.mxu0 %v513_v0  ;;  %487 = vmatpush3.bf16.msra.mxu1 %v514_v1  ;;  %v87_v4 = vld [vmem:[#allocation2] sm:$0xff]  ;;  %v89_v6 = vld [vmem:[#allocation2 + $0x10] sm:$0xff]  ;;  %v90_v8 = vld [vmem:[#allocation2 + $0x18] sm:$0xff]  ;;  %s382_s15 = sshll.u32 %s677_s14, 4  ;;  %s394_s17 = sshll.u32 %s678_s16, 4  ;;  %s383_s15 = int_to_ptr.vmem [resolvable:$true] %s382_s15  ;;  %s395_s17 = int_to_ptr.vmem [resolvable:$true] %s394_s17 }
  0x38   :  { %480 = vmatprep.subr.bf16.mxu0 %v515_v2  ;;  %488 = vmatprep.subr.bf16.mxu1 %v516_v3  ;;  %v91_v7 = vpack.c.bf16 %v88_v5, %v87_v4  ;;  %v92_v9 = vpack.c.bf16 %v90_v8, %v89_v6  ;;  %v517_v10 = vld [vmem:[#allocation8 + $0x8] sm:$0xff]   ;;  %v518_v11 = vld [vmem:[#allocation8] sm:$0xff]   ;;  %p604_p7 = scmp.lt.s32.totalorder %s383_s15, %s383_s15 }
  0x39   :  { %v427_v12 = vld [vmem:[%s800_s4] ss:$0 sm:$0xff] }
  0x3a   :  { %482 = vmatprep.mubr.msk.bf16.mxu0 %vm116_vm0, %v91_v7  ;;  %490 = vmatprep.mubr.msk.bf16.mxu1 %vm116_vm0, %v91_v7  ;;  %v436_v13 = vld [vmem:[%s801_s5] ss:$0 sm:$0xff] }
  0x3b   :  { %481 = vmatpush3.bf16.msra.mxu0 %v515_v2  ;;  %489 = vmatpush3.bf16.msra.mxu1 %v516_v3  ;;  %v445_v31 = vld [vmem:[%s802_s6] ss:$0 sm:$0xff]  ;;  %s599_s6 = scalar_lea.vmem %s383_s15, 256 }
  0x3c   :  { %494 = vmatprep.subr.bf16.mxu0 %v517_v10  ;;  %p600_p6 = scmp.ne.s32.totalorder %s383_s15, %s599_s6  ;;  %p605_p8 = scmp.lt.s32.totalorder %s599_s6, %s599_s6 }
  0x3e   :  { %483 = vmatmul.mubr.msk.bf16.vlgmr.msra.gmra.mxu0 %vm116_vm0, %v92_v9  ;;  %491 = vmatmul.mubr.msk.bf16.vlgmr.msra.gmra.mxu1 %vm116_vm0, %v92_v9  ;;  %p606_p9 = por %p605_p8, %p604_p7 }
  0x3f   :  { %495 = vmatpush3.bf16.msra.mxu0 %v517_v10  ;;  %498 = vmatprep.mubr.msk.bf16.mxu0 %vm116_vm0, %v91_v7 }
  0x40   :  { %496 = vmatprep.subr.bf16.mxu0 %v518_v11  ;;  %p607_p10 = pnand %p606_p9, %p600_p6 }
  0x43   :  { %497 = vmatpush3.bf16.msra.mxu0 %v518_v11 }
  0x46   :  { %499 = vmatmul.mubr.msk.bf16.vlgmr.msra.gmra.mxu0 %vm116_vm0, %v92_v9 }
  0xfe   :  { %v484_v14 = vpop.f32.mrf.mxu0  ;;  %v492_v16 = vpop.f32.mrf.mxu1 }
  0xff   :  { %v166_v15 = vadd.f32 %v484_v14, %v427_v12  ;;  %v259_v18 = vadd.f32 %v492_v16, %v436_v13 }
 0x100   :  { %v157_v17 = vpop.f32.mrf.mxu0  ;;  %v250_v21 = vpop.f32.mrf.mxu1 }
 0x101   :  { %v456_v19 = vpack.c.bf16 %v166_v15, %v166_v15  ;;  %v158_v20 = vadd.f32 %v427_v12, %v157_v17  ;;  %v460_v22 = vpack.c.bf16 %v259_v18, %v259_v18  ;;  %v251_v24 = vadd.f32 %v436_v13, %v250_v21 }
 0x102   :  { %v485_v23 = vpop.f32.mrf.mxu0  ;;  %v493_v27 = vpop.f32.mrf.mxu1 }
 0x103   :  { %191 = vst.msk [vmem:[#allocation10 + $0x8] sm:$0xf] %vm188_vm1, %v456_v19  ;;  %v454_v25 = vpack.c.bf16 %v158_v20, %v158_v20  ;;  %v169_v26 = vadd.f32 %v485_v23, %v427_v12  ;;  %283 = vst.msk [vmem:[#allocation11 + $0x8] sm:$0xf] %vm188_vm1, %v460_v22  ;;  %v458_v28 = vpack.c.bf16 %v251_v24, %v251_v24 }
 0x104   :  { %v160_v29 = vpop.f32.mrf.mxu0  ;;  %v262_v30 = vadd.f32 %v493_v27, %v436_v13  ;;  %v253_v34 = vpop.f32.mrf.mxu1 }
 0x105   :  { %189 = vst.msk [vmem:[#allocation10] sm:$0xf] %vm188_vm1, %v454_v25  ;;  %v457_v32 = vpack.c.bf16 %v169_v26, %v169_v26  ;;  %v161_v33 = vadd.f32 %v427_v12, %v160_v29  ;;  %281 = vst.msk [vmem:[#allocation11] sm:$0xf] %vm188_vm1, %v458_v28  ;;  %v254_v36 = vadd.f32 %v436_v13, %v253_v34 }
 0x106   :  { %v461_v35 = vpack.c.bf16 %v262_v30, %v262_v30  ;;  %v500_v37 = vpop.f32.mrf.mxu0 }
 0x107   :  { %192 = vst.msk [vmem:[#allocation10 + $0xc] sm:$0xf] %vm188_vm1, %v457_v32  ;;  %v455_v38 = vpack.c.bf16 %v161_v33, %v161_v33  ;;  %v351_v39 = vadd.f32 %v500_v37, %v445_v31  ;;  %v459_v40 = vpack.c.bf16 %v254_v36, %v254_v36 }
 0x108   :  { %284 = vst.msk [vmem:[#allocation11 + $0xc] sm:$0xf] %vm188_vm1, %v461_v35  ;;  %v342_v41 = vpop.f32.mrf.mxu0 }
 0x109   :  { %190 = vst.msk [vmem:[#allocation10 + $0x4] sm:$0xf] %vm188_vm1, %v455_v38  ;;  %v464_v42 = vpack.c.bf16 %v351_v39, %v351_v39  ;;  %v343_v43 = vadd.f32 %v445_v31, %v342_v41  ;;  %282 = vst.msk [vmem:[#allocation11 + $0x4] sm:$0xf] %vm188_vm1, %v459_v40 }
 0x10a   :  { %v501_v44 = vpop.f32.mrf.mxu0 }
 0x10b   :  { %610 = shalt.err (!%p607_p10)
}
 0x10c   :  { %388 = dma.vmem_to_hbm [thread:$0]  %s383_s15, 256, %s803_s7, [#allocation4], %s670_s12, %s670_s12, %s671_s13   ;;  %375 = vst.msk [vmem:[#allocation13 + $0x8] sm:$0xf] %vm188_vm1, %v464_v42  ;;  %v462_v45 = vpack.c.bf16 %v343_v43, %v343_v43  ;;  %v354_v46 = vadd.f32 %v501_v44, %v445_v31 }
 0x10d   :  { %s619_s20 = scalar_lea.vmem %s395_s17, 256  ;;  %p624_p12 = scmp.lt.s32.totalorder %s395_s17, %s395_s17 }
 0x10e   :  { %p620_p11 = scmp.ne.s32.totalorder %s395_s17, %s619_s20  ;;  %p625_p13 = scmp.lt.s32.totalorder %s619_s20, %s619_s20 }
 0x110   :  { %p626_p0 = por %p625_p13, %p624_p12 }
 0x112   :  { %p627_p1 = pnand %p626_p0, %p620_p11 }
 0x114   :  { %630 = shalt.err (!%p627_p1)
}
 0x115   :  { %400 = dma.vmem_to_hbm [thread:$0]  %s395_s17, 256, %s804_s8, [#allocation12], %s670_s12, %s670_s12, %s671_s13   ;;  %v345_v47 = vpop.f32.mrf.mxu0  ;;  %373 = vst.msk [vmem:[#allocation13] sm:$0xf] %vm188_vm1, %v462_v45  ;;  %v465_v48 = vpack.c.bf16 %v354_v46, %v354_v46 }
 0x116   :  { %s679_s7 = smov [#allocation13]   ;;  %v346_v49 = vadd.f32 %v445_v31, %v345_v47 }
 0x117   :  { %s406_s23 = sshll.u32 %s679_s7, 4  ;;  %376 = vst.msk [vmem:[#allocation13 + $0xc] sm:$0xf] %vm188_vm1, %v465_v48  ;;  %s407_s23 = int_to_ptr.vmem [resolvable:$true] %s406_s23 }
 0x118   :  { %v463_v50 = vpack.c.bf16 %v346_v49, %v346_v49  ;;  %s639_s24 = scalar_lea.vmem %s407_s23, 256  ;;  %p644_p3 = scmp.lt.s32.totalorder %s407_s23, %s407_s23 }
 0x119   :  { %p640_p2 = scmp.ne.s32.totalorder %s407_s23, %s639_s24  ;;  %p645_p4 = scmp.lt.s32.totalorder %s639_s24, %s639_s24 }
 0x11a   :  { %374 = vst.msk [vmem:[#allocation13 + $0x4] sm:$0xf] %vm188_vm1, %v463_v50 }
 0x11b   :  { %p646_p5 = por %p645_p4, %p644_p3 }
 0x11d   :  { %p647_p6 = pnand %p646_p5, %p640_p2 }
 0x11f   :  { %650 = shalt.err (!%p647_p6)
}
 0x120   :  { %412 = dma.vmem_to_hbm [thread:$0]  %s407_s23, 256, %s805_s9, [#allocation12], %s670_s12, %s670_s12, %s671_s13  }
 0x121   :  { %665 = dma.done.wait [#allocation4], 256  }
 0x122   :  { %666 = vsyncadd [#allocation4], 4294967040 }
 0x123   :  { %667 = dma.done.wait [#allocation12], 512  }
 0x124   :  { %668 = vsyncadd [#allocation12], 4294966784 }
 0x125   :  { %422 = vsyncpa [#allocation3], 1 }
 0x126   :  { %423 = vsyncpa [#allocation6], 1 }
 0x127   :  { %424 = vsyncpa [#allocation9], 1 }
 0x128   :  { %425 = vsyncpa [#allocation4], 1 }
 0x129   :  { %426 = vsyncpa [#allocation12], 1 }

</bundles_post_ra>
